<compile_context>
chip_gen: v5e
topology: v5e:2x2
jax: 0.10.0
libtpu: 0.0.40
codegen_flags: <defaults>
</compile_context>

<pallas_src>
import jax
import jax.numpy as jnp
from jax.experimental import pallas as pl
from jax.experimental.pallas import tpu as pltpu


def attflat_mem_kernel(xmem_ref, x_ref, bias_ref, w1_ref, b1_ref,
                       w2t_ref, b2_ref, wm_ref, bm_ref, out_ref):
    tb, s, h_dim = xmem_ref.shape          # block_b sequences per program
    g_total, _ = w2t_ref.shape             # glimpses
    o_pad = out_ref.shape[-1]              # lane-dense (multiple of 128)

    xm2 = xmem_ref[...].reshape(tb * s, h_dim)    # (TB*S, H) — batched MLP input
    x3 = x_ref[...]                               # (TB, S, H)
    bias = bias_ref[...]                          # (TB, S, 1), 0 or -1e30

    # --- MLP first layer on the MXU: (TB*S, H) x (H, M), ReLU ---------------
    hidden = jnp.dot(xm2, w1_ref[...], preferred_element_type=jnp.float32)
    hidden = jnp.maximum(hidden + b1_ref[...], 0.0)           # (TB*S, M)

    w2_rows = w2t_ref[...]                                    # (G, M)
    b2_row = b2_ref[...]                                      # (1, G)

    # Accumulator starts at the (broadcast) merge bias; per-glimpse merge dots
    # are summed into it (equivalent to concat + single dot, without the concat).
    acc = jnp.broadcast_to(bm_ref[...], (tb, o_pad)).astype(jnp.float32)

    for g in range(g_total):                                  # G is 1 or 2 — unrolled
        # Glimpse score: VPU multiply + lane reduce over M (avoids N=1 matmul).
        score = jnp.sum(hidden * w2_rows[g:g + 1, :], axis=-1, keepdims=True)
        score = score + b2_row[:, g:g + 1]                    # (TB*S, 1)
        score = score.reshape(tb, s, 1) + bias                # masked_fill as add

        # Softmax over the sequence axis (f32, exact reciprocal).
        mx = jnp.max(score, axis=1, keepdims=True)            # (TB, 1, 1)
        e = jnp.exp(score - mx)
        denom = jnp.sum(e, axis=1, keepdims=True)
        att = e * (1.0 / denom)                               # (TB, S, 1)

        # Glimpse pooling: broadcast-multiply + sublane reduce (no transpose).
        pooled = jnp.sum(att * x3, axis=1)                    # (TB, H)

        # Merge contribution of this glimpse on the MXU.
        acc = acc + jnp.dot(pooled, wm_ref[g * h_dim:(g + 1) * h_dim, :],
                            preferred_element_type=jnp.float32)

    out_ref[0] = acc                                          # (TB, O_pad)


def _round_up(n, m):
    return ((n + m - 1) // m) * m


def attflat_mem(x_mem, x, x_mask, params, glimpses, block_b=None):
    B, S, H = x_mem.shape
    M = params["w1"].shape[1]
    G = glimpses
    O = params["wm"].shape[1]
    O_pad = _round_up(O, 128)        # lane-dense output block (unmasked stores)

    if block_b is None:
        # Pick the largest divisor of B such that block_b*S approaches the MXU
        # row dimension (~256) without exploding VMEM.
        target = max(1, 256 // max(S, 1))
        block_b = 1
        for d in range(1, min(B, target) + 1):
            if B % d == 0:
                block_b = d
    assert B % block_b == 0, "block_b must divide the batch"
    nb = B // block_b

    x_mem = x_mem.astype(jnp.float32)
    x = x.astype(jnp.float32)

    # Additive mask bias: finite large-negative instead of -inf (same result
    # unless a sequence is fully masked, where -inf would produce NaN anyway).
    bias = x_mask.reshape(B, S, 1).astype(jnp.float32) * jnp.float32(-1e30)

    w1 = params["w1"].astype(jnp.float32)                       # (H, M)
    b1 = params["b1"].reshape(1, M).astype(jnp.float32)
    w2t = params["w2"].T.astype(jnp.float32)                    # (G, M)
    b2 = params["b2"].reshape(1, G).astype(jnp.float32)
    wm = params["wm"].astype(jnp.float32)                       # (G*H, O)
    bm = params["bm"].reshape(1, O).astype(jnp.float32)
    if O_pad != O:
        wm = jnp.pad(wm, ((0, 0), (0, O_pad - O)))
        bm = jnp.pad(bm, ((0, 0), (0, O_pad - O)))

    flops = 2 * B * S * H * M + 2 * B * S * M * G + 2 * B * S * H * G + 2 * B * G * H * O_pad
    bytes_accessed = 4 * (2 * B * S * H + B * S + H * M + M + G * M + G
                          + G * H * O_pad + O_pad + B * O_pad)

    out = pl.pallas_call(
        attflat_mem_kernel,
        out_shape=jax.ShapeDtypeStruct((nb, block_b, O_pad), jnp.float32),
        grid_spec=pltpu.PrefetchScalarGridSpec(
            num_scalar_prefetch=0,
            grid=(nb,),
            in_specs=[
                pl.BlockSpec((block_b, S, H), lambda i: (i, 0, 0)),   # x_mem
                pl.BlockSpec((block_b, S, H), lambda i: (i, 0, 0)),   # x
                pl.BlockSpec((block_b, S, 1), lambda i: (i, 0, 0)),   # mask bias
                pl.BlockSpec((H, M), lambda i: (0, 0)),               # w1 (resident)
                pl.BlockSpec((1, M), lambda i: (0, 0)),               # b1
                pl.BlockSpec((G, M), lambda i: (0, 0)),               # w2^T
                pl.BlockSpec((1, G), lambda i: (0, 0)),               # b2
                pl.BlockSpec((G * H, O_pad), lambda i: (0, 0)),       # w_merge (padded)
                pl.BlockSpec((1, O_pad), lambda i: (0, 0)),           # b_merge (padded)
            ],
            out_specs=pl.BlockSpec((1, block_b, O_pad), lambda i: (i, 0, 0)),
        ),
        compiler_params=pltpu.CompilerParams(
            dimension_semantics=("parallel",),
            vmem_limit_bytes=32 * 1024 * 1024,
        ),
        cost_estimate=pl.CostEstimate(flops=flops,
                                      transcendentals=B * S * G,
                                      bytes_accessed=bytes_accessed),
    )(x_mem, x, bias, w1, b1, w2t, b2, wm, bm)

    return out.reshape(B, O_pad)[:, :O]


def attflat_mem_reference(x_mem, x, x_mask, params, glimpses):
    B, S, H = x_mem.shape
    hp = jax.lax.Precision.HIGHEST
    h = jnp.maximum(jnp.matmul(x_mem, params["w1"], precision=hp) + params["b1"], 0.0)
    att = jnp.matmul(h, params["w2"], precision=hp) + params["b2"]      # (B, S, G)
    mask = x_mask.reshape(B, S, 1)
    att = jnp.where(mask, -jnp.inf, att)
    att = jax.nn.softmax(att, axis=1)
    pooled = jnp.einsum("bsg,bsh->bgh", att, x, precision=hp).reshape(B, glimpses * H)
    return jnp.matmul(pooled, params["wm"], precision=hp) + params["bm"]


if __name__ == "__main__":
    B, S = 4, 8
    HIDDEN_SIZE = 32
    FLAT_MLP_SIZE = 32
    FLAT_OUT_SIZE = 64

    key = jax.random.PRNGKey(0)

    # Boolean mask (B, 1, 1, S): True = padded position (masked out).
    lengths = jnp.array([S, S - 3, S - 1, 2])
    pos = jnp.arange(S)[None, :]
    x_mask = (pos >= lengths[:, None]).reshape(B, 1, 1, S)

    for glimpses in (1, 2):
        ks = jax.random.split(jax.random.fold_in(key, glimpses), 8)
        x_mem = jax.random.normal(ks[0], (B, S, HIDDEN_SIZE), dtype=jnp.float32)
        x = jax.random.normal(ks[1], (B, S, HIDDEN_SIZE), dtype=jnp.float32)

        scale = 0.1
        params = {
            "w1": scale * jax.random.normal(ks[2], (HIDDEN_SIZE, FLAT_MLP_SIZE), jnp.float32),
            "b1": scale * jax.random.normal(ks[3], (FLAT_MLP_SIZE,), jnp.float32),
            "w2": scale * jax.random.normal(ks[4], (FLAT_MLP_SIZE, glimpses), jnp.float32),
            "b2": scale * jax.random.normal(ks[5], (glimpses,), jnp.float32),
            "wm": scale * jax.random.normal(ks[6], (HIDDEN_SIZE * glimpses, FLAT_OUT_SIZE), jnp.float32),
            "bm": scale * jax.random.normal(ks[7], (FLAT_OUT_SIZE,), jnp.float32),
        }

        ref = attflat_mem_reference(x_mem, x, x_mask, params, glimpses)

        # Exercise both an explicit block_b and the auto heuristic.
        for bb in (2, None):
            out = attflat_mem(x_mem, x, x_mask, params, glimpses, block_b=bb)
            out = jax.block_until_ready(out)
            assert out.shape == (B, FLAT_OUT_SIZE)
            assert jnp.allclose(out, ref, atol=1e-5, rtol=1e-5), \
                f"mismatch vs reference (G={glimpses}, block_b={bb})"

    print("KERNEL_OK")
</pallas_src>

<mosaic_0001>
module attributes {stable_mosaic.version = 11 : i64} {
  func.func @attflat_mem_kernel(%arg0: i32, %arg1: memref<2x8x32xf32, #tpu.memory_space<vmem>>, %arg2: memref<2x8x32xf32, #tpu.memory_space<vmem>>, %arg3: memref<2x8x1xf32, #tpu.memory_space<vmem>>, %arg4: memref<32x32xf32, #tpu.memory_space<vmem>>, %arg5: memref<1x32xf32, #tpu.memory_space<vmem>>, %arg6: memref<1x32xf32, #tpu.memory_space<vmem>>, %arg7: memref<1x1xf32, #tpu.memory_space<vmem>>, %arg8: memref<32x128xf32, #tpu.memory_space<vmem>>, %arg9: memref<1x128xf32, #tpu.memory_space<vmem>>, %arg10: memref<1x2x128xf32, #tpu.memory_space<vmem>>) attributes {dimension_semantics = [#tpu.dimension_semantics<parallel>], iteration_bounds = array<i64: 2>, scalar_prefetch = 0 : i64, scratch_operands = 0 : i64, tpu.core_type = #tpu.core_type<tc>, window_params = [{transform_indices = @transform_0, window_bounds = array<i64: 2, 8, 32>}, {transform_indices = @transform_1, window_bounds = array<i64: 2, 8, 32>}, {transform_indices = @transform_2, window_bounds = array<i64: 2, 8, 1>}, {pipeline_mode = #tpu.pipeline_mode<synchronous>, transform_indices = @transform_3, window_bounds = array<i64: 32, 32>}, {pipeline_mode = #tpu.pipeline_mode<synchronous>, transform_indices = @transform_4, window_bounds = array<i64: 1, 32>}, {pipeline_mode = #tpu.pipeline_mode<synchronous>, transform_indices = @transform_5, window_bounds = array<i64: 1, 32>}, {pipeline_mode = #tpu.pipeline_mode<synchronous>, transform_indices = @transform_6, window_bounds = array<i64: 1, 1>}, {pipeline_mode = #tpu.pipeline_mode<synchronous>, transform_indices = @transform_7, window_bounds = array<i64: 32, 128>}, {pipeline_mode = #tpu.pipeline_mode<synchronous>, transform_indices = @transform_8, window_bounds = array<i64: 1, 128>}, {transform_indices = @transform_9, window_bounds = array<i64: 1, 2, 128>}]} {
    %c0 = arith.constant 0 : index
    %c0_0 = arith.constant 0 : index
    %c0_1 = arith.constant 0 : index
    %0 = vector.load %arg1[%c0, %c0_0, %c0_1] : memref<2x8x32xf32, #tpu.memory_space<vmem>>, vector<2x8x32xf32>
    %1 = vector.shape_cast %0 : vector<2x8x32xf32> to vector<16x32xf32>
    %c0_2 = arith.constant 0 : index
    %c0_3 = arith.constant 0 : index
    %c0_4 = arith.constant 0 : index
    %2 = vector.load %arg2[%c0_2, %c0_3, %c0_4] : memref<2x8x32xf32, #tpu.memory_space<vmem>>, vector<2x8x32xf32>
    %c0_5 = arith.constant 0 : index
    %c0_6 = arith.constant 0 : index
    %c0_7 = arith.constant 0 : index
    %3 = vector.load %arg3[%c0_5, %c0_6, %c0_7] : memref<2x8x1xf32, #tpu.memory_space<vmem>>, vector<2x8x1xf32>
    %c0_8 = arith.constant 0 : index
    %c0_9 = arith.constant 0 : index
    %4 = vector.load %arg4[%c0_8, %c0_9] : memref<32x32xf32, #tpu.memory_space<vmem>>, vector<32x32xf32>
    %cst = arith.constant dense<0.000000e+00> : vector<16x32xf32>
    %5 = tpu.matmul %1, %4, %cst {dimension_numbers = #tpu.dot_dimension_numbers<[1], [0], [0], [1], [0, 0, 1, 1], [], []>} : vector<16x32xf32>, vector<32x32xf32>, vector<16x32xf32> -> vector<16x32xf32>
    %c0_10 = arith.constant 0 : index
    %c0_11 = arith.constant 0 : index
    %6 = vector.load %arg5[%c0_10, %c0_11] : memref<1x32xf32, #tpu.memory_space<vmem>>, vector<1x32xf32>
    %7 = vector.broadcast %6 : vector<1x32xf32> to vector<16x32xf32>
    %8 = arith.addf %5, %7 : vector<16x32xf32>
    %cst_12 = arith.constant 0.000000e+00 : f32
    %9 = vector.broadcast %cst_12 : f32 to vector<16x32xf32>
    %10 = arith.maximumf %8, %9 : vector<16x32xf32>
    %c0_13 = arith.constant 0 : index
    %c0_14 = arith.constant 0 : index
    %11 = vector.load %arg6[%c0_13, %c0_14] : memref<1x32xf32, #tpu.memory_space<vmem>>, vector<1x32xf32>
    %c0_15 = arith.constant 0 : index
    %c0_16 = arith.constant 0 : index
    %12 = vector.load %arg7[%c0_15, %c0_16] : memref<1x1xf32, #tpu.memory_space<vmem>>, vector<1x1xf32>
    %c0_17 = arith.constant 0 : index
    %c0_18 = arith.constant 0 : index
    %13 = vector.load %arg9[%c0_17, %c0_18] : memref<1x128xf32, #tpu.memory_space<vmem>>, vector<1x128xf32>
    %14 = vector.shape_cast %13 : vector<1x128xf32> to vector<1x128xf32>
    %15 = vector.broadcast %14 : vector<1x128xf32> to vector<2x128xf32>
    %16 = vector.broadcast %11 : vector<1x32xf32> to vector<16x32xf32>
    %17 = arith.mulf %10, %16 : vector<16x32xf32>
    %cst_19 = arith.constant dense<0.000000e+00> : vector<16xf32>
    %18 = vector.multi_reduction <add>, %17, %cst_19 [1] : vector<16x32xf32> to vector<16xf32>
    %19 = vector.shape_cast %18 : vector<16xf32> to vector<16x1xf32>
    %20 = vector.broadcast %12 : vector<1x1xf32> to vector<16x1xf32>
    %21 = arith.addf %19, %20 : vector<16x1xf32>
    %22 = vector.shape_cast %21 : vector<16x1xf32> to vector<2x8x1xf32>
    %23 = arith.addf %22, %3 : vector<2x8x1xf32>
    %cst_20 = arith.constant dense<0xFF800000> : vector<2x1xf32>
    %24 = vector.multi_reduction <maximumf>, %23, %cst_20 [1] : vector<2x8x1xf32> to vector<2x1xf32>
    %25 = vector.shape_cast %24 : vector<2x1xf32> to vector<2x1x1xf32>
    %26 = vector.broadcast %25 : vector<2x1x1xf32> to vector<2x8x1xf32>
    %27 = arith.subf %23, %26 : vector<2x8x1xf32>
    %28 = math.exp %27 : vector<2x8x1xf32>
    %cst_21 = arith.constant dense<0.000000e+00> : vector<2x1xf32>
    %29 = vector.multi_reduction <add>, %28, %cst_21 [1] : vector<2x8x1xf32> to vector<2x1xf32>
    %30 = vector.shape_cast %29 : vector<2x1xf32> to vector<2x1x1xf32>
    %cst_22 = arith.constant 1.000000e+00 : f32
    %31 = vector.broadcast %cst_22 : f32 to vector<2x1x1xf32>
    %32 = arith.divf %31, %30 : vector<2x1x1xf32>
    %33 = vector.broadcast %32 : vector<2x1x1xf32> to vector<2x8x1xf32>
    %34 = arith.mulf %28, %33 : vector<2x8x1xf32>
    %35 = vector.broadcast %34 : vector<2x8x1xf32> to vector<2x8x32xf32>
    %36 = arith.mulf %35, %2 : vector<2x8x32xf32>
    %cst_23 = arith.constant dense<0.000000e+00> : vector<2x32xf32>
    %37 = vector.multi_reduction <add>, %36, %cst_23 [1] : vector<2x8x32xf32> to vector<2x32xf32>
    %c0_24 = arith.constant 0 : index
    %c0_25 = arith.constant 0 : index
    %38 = vector.load %arg8[%c0_24, %c0_25] : memref<32x128xf32, #tpu.memory_space<vmem>>, vector<32x128xf32>
    %cst_26 = arith.constant dense<0.000000e+00> : vector<2x128xf32>
    %39 = tpu.matmul %37, %38, %cst_26 {dimension_numbers = #tpu.dot_dimension_numbers<[1], [0], [0], [1], [0, 0, 1, 1], [], []>} : vector<2x32xf32>, vector<32x128xf32>, vector<2x128xf32> -> vector<2x128xf32>
    %40 = arith.addf %15, %39 : vector<2x128xf32>
    %c0_27 = arith.constant 0 : index
    %c0_28 = arith.constant 0 : index
    %c0_29 = arith.constant 0 : index
    %41 = vector.load %arg10[%c0_27, %c0_28, %c0_29] : memref<1x2x128xf32, #tpu.memory_space<vmem>>, vector<1x2x128xf32>
    %42 = vector.shape_cast %41 : vector<1x2x128xf32> to vector<2x128xf32>
    %43 = vector.shape_cast %40 : vector<2x128xf32> to vector<1x2x128xf32>
    tpu.vector_store %arg10[%c0_27, %c0_28, %c0_29], %43 {strides = array<i32>} : memref<1x2x128xf32, #tpu.memory_space<vmem>>, vector<1x2x128xf32>,
    return
  }
  func.func @transform_0(%arg0: i32) -> (i32, i32, i32) {
    %c0_i32 = arith.constant 0 : i32
    %c0_i32_0 = arith.constant 0 : i32
    %c0_i32_1 = arith.constant 0 : i32
    return %arg0, %c0_i32, %c0_i32_0 : i32, i32, i32
  }
  func.func @transform_1(%arg0: i32) -> (i32, i32, i32) {
    %c0_i32 = arith.constant 0 : i32
    %c0_i32_0 = arith.constant 0 : i32
    %c0_i32_1 = arith.constant 0 : i32
    return %arg0, %c0_i32, %c0_i32_0 : i32, i32, i32
  }
  func.func @transform_2(%arg0: i32) -> (i32, i32, i32) {
    %c0_i32 = arith.constant 0 : i32
    %c0_i32_0 = arith.constant 0 : i32
    %c0_i32_1 = arith.constant 0 : i32
    return %arg0, %c0_i32, %c0_i32_0 : i32, i32, i32
  }
  func.func @transform_3(%arg0: i32) -> (i32, i32) {
    %c0_i32 = arith.constant 0 : i32
    %c0_i32_0 = arith.constant 0 : i32
    %c0_i32_1 = arith.constant 0 : i32
    return %c0_i32, %c0_i32_0 : i32, i32
  }
  func.func @transform_4(%arg0: i32) -> (i32, i32) {
    %c0_i32 = arith.constant 0 : i32
    %c0_i32_0 = arith.constant 0 : i32
    %c0_i32_1 = arith.constant 0 : i32
    return %c0_i32, %c0_i32_0 : i32, i32
  }
  func.func @transform_5(%arg0: i32) -> (i32, i32) {
    %c0_i32 = arith.constant 0 : i32
    %c0_i32_0 = arith.constant 0 : i32
    %c0_i32_1 = arith.constant 0 : i32
    return %c0_i32, %c0_i32_0 : i32, i32
  }
  func.func @transform_6(%arg0: i32) -> (i32, i32) {
    %c0_i32 = arith.constant 0 : i32
    %c0_i32_0 = arith.constant 0 : i32
    %c0_i32_1 = arith.constant 0 : i32
    return %c0_i32, %c0_i32_0 : i32, i32
  }
  func.func @transform_7(%arg0: i32) -> (i32, i32) {
    %c0_i32 = arith.constant 0 : i32
    %c0_i32_0 = arith.constant 0 : i32
    %c0_i32_1 = arith.constant 0 : i32
    return %c0_i32, %c0_i32_0 : i32, i32
  }
  func.func @transform_8(%arg0: i32) -> (i32, i32) {
    %c0_i32 = arith.constant 0 : i32
    %c0_i32_0 = arith.constant 0 : i32
    %c0_i32_1 = arith.constant 0 : i32
    return %c0_i32, %c0_i32_0 : i32, i32
  }
  func.func @transform_9(%arg0: i32) -> (i32, i32, i32) {
    %c0_i32 = arith.constant 0 : i32
    %c0_i32_0 = arith.constant 0 : i32
    %c0_i32_1 = arith.constant 0 : i32
    return %arg0, %c0_i32, %c0_i32_0 : i32, i32, i32
  }
}

</mosaic_0001>

<bundles_post_ra>
// kernel: tpu_custom_call.1
= control target key start
LH: loop header
LB: loop body
LE: loop exit
PB: predicated region body
PF: predicated region fallthrough
CT: control target
= control target key end

     0   :  { %s1283_s0 = inlined_call_operand.vmem [shape: f32[4,8,32], index: 0, kind: input, shape index: {}]   ;;  %s1284_s1 = inlined_call_operand.hbm [shape: f32[4,8,32], index: 1, kind: input, shape index: {}]   ;;  %s1285_s2 = inlined_call_operand.vmem [shape: f32[4,8,1], index: 2, kind: input, shape index: {}]   ;;  %s1286_s3 = inlined_call_operand.hbm [shape: f32[32,32], index: 3, kind: input, shape index: {}]   ;;  %s1287_s4 = inlined_call_operand.vmem [shape: f32[1,32], index: 4, kind: input, shape index: {}]   ;;  %s1288_s5 = inlined_call_operand.vmem [shape: f32[1,32], index: 5, kind: input, shape index: {}]   ;;  %s1289_s6 = inlined_call_operand.<no memory space> [shape: f32[1,1], index: 6, kind: input, shape index: {}]   ;;  %s1290_s7 = inlined_call_operand.hbm [shape: f32[32,128], index: 7, kind: input, shape index: {}]   ;;  %s1291_s8 = inlined_call_operand.vmem [shape: f32[1,128], index: 8, kind: input, shape index: {}]   ;;  %s1292_s9 = inlined_call_operand.hbm [shape: f32[2,2,128], index: 9, kind: output, shape index: {}]  }
   0x1   :  { %1295 = sst [smem:[#allocation13_spill]] %s1286_s3  ;;  %v14_v0 = vstv %s1289_s6 }
   0x2   :  { %1296 = sst [smem:[#allocation14_spill]] %s1290_s7  ;;  %15 = vst [vmem:[#allocation2] sm:$0x1] %v14_v0 }
   0x3   :  { %16 = vsyncpa [#allocation4], 0 }
   0x4   :  { %18 = vsyncpa [#allocation4 + $0x1], 0 }
   0x5   :  { %19 = vsyncpa [#allocation7], 0 }
   0x6   :  { %20 = vsyncpa [#allocation5], 0 }
   0x7   :  { %22 = vsyncpa [#allocation5 + $0x1], 0  ;;  %s1090_s11 = smov 0   ;;  %s1092_s12 = smov 0  }
   0x8   :  { %s1094_s13 = smov 0   ;;  %s1096_s14 = smov 0  }
   0x9 LB: > { %s1111_s6 = sadd.s32 4294967295, %s1030_s14   ;;  %s757_s15 = sadd.s32 4294967294, %s1030_s14   ;;  %s1030_s14 = sphi %s1096_s14, %s1310_s14   ;;  %s1026_s13 = sphi %s1094_s13, %s1309_s13   ;;  %s1022_s12 = sphi %s1092_s12, %s1308_s12   ;;  %s1018_s11 = sphi %s1090_s11, %s1307_s11  }
   0xa   : > { %p74_p0 = scmp.ne.s32.totalorder %s1022_s12, %s1018_s11  ;;  %p75_p1 = scmp.eq.s32.totalorder %s1111_s6, 0 }
   0xb   : > { %p250_p2 = scmp.eq.s32.totalorder %s1111_s6, 1  ;;  %p256_p3 = scmp.eq.s32.totalorder %s757_s15, 1 }
   0xc   : > { %p1120_p4 = por %p75_p1, %p74_p0  ;;  %p758_p5 = scmp.ge.s32.totalorder %s1030_s14, 1 }
   0xd   : > { %p1125_p6 = por %p256_p3, %p74_p0  ;;  %p263_p7 = scmp.lt.s32.totalorder %s1030_s14, 3 }
   0xe   : > { %s1299_s3 = sld [smem:[#allocation13_spill]]  ;;  %s1032_s22 = smov [#allocation6]  }
   0xf   : > { %p1133_p8 = pnand %p758_p5, %p263_p7  ;;  %s276_s23 = sshll.u32 %s1032_s22, 4  ;;  %s277_s23 = int_to_ptr.vmem [resolvable:$true] %s276_s23 }
  0x10   : > { %s1301_s7 = sld [smem:[#allocation14_spill]]  ;;  %s1293_s27 = smov 128  }
  0x11   : > { %p798_p9 = pneg %p1133_p8  ;;  %s1294_s28 = smov 8  }
  0x12   : > { %s1035_s29 = smov [#allocation8]   ;;  %s1152_s10 = sadd.s32 1, %s1030_s14  }
  0x13   : > { %p799_p10 = pnand %p798_p9, %p75_p1  ;;  %s299_s30 = sshll.u32 %s1035_s29, 4  ;;  %s300_s30 = int_to_ptr.vmem [resolvable:$true] %s299_s30 }
  0x14   : > { %s274_s20 = sshll.u32 %s1299_s3, 4  ;;  %s61_s15 = sadd.s32 1, %s1026_s13  ;;  %s275_s20 = int_to_ptr.hbm [resolvable:$true] %s274_s20 }
  0x15   : > { %801 = dma.hbm_to_vmem [thread:$0]  (!%p799_p10), %s275_s20, 512, %s277_s23, [#allocation7], %s1293_s27, %s1293_s27, %s1294_s28  }
  0x16   : > { %s297_s26 = sshll.u32 %s1301_s7, 4  ;;  %s58_s18 = ssub.s32 %s1030_s14, %s1152_s10  ;;  %s298_s26 = int_to_ptr.hbm [resolvable:$true] %s297_s26 }
  0x17   : > { %804 = dma.hbm_to_vmem [thread:$0]  (!%p799_p10), %s298_s26, 512, %s300_s30, [#allocation7], %s1293_s27, %s1293_s27, %s1294_s28  }
  0x18   : > { %p68_p12 = scmp.ne.s32.totalorder %s1026_s13, %s1022_s12  ;;  %p59_p13 = scmp.eq.s32.totalorder %s58_s18, 0 }
  0x19   : > { %p69_p0 = scmp.eq.s32.totalorder %s1030_s14, 0  ;;  %p815_p5 = scmp.lt.s32.totalorder %s1030_s14, 2 }
  0x1a   : > { %p1162_p3 = por %p250_p2, %p68_p12  ;;  %s325_s22 = sand.u32 1, %s1026_s13  }
  0x1b   : > { %s1168_s20 = scalar_select %p59_p13, %s1026_s13, %s61_s15  }
  0x1c   : > { %p70_p7 = por %p69_p0, %p68_p12  ;;  %s762_s23 = sshll.u32 %s325_s22, 4 }
  0x1d   : > { %s781_s24 = sshll.u32 %s1030_s14, 4  ;;  %s329_s30 = scalar_lea.vmem [#allocation3], %s762_s23 }
  0x1e   : > { %s334_s29 = scalar_lea.hbm %s1284_s1, %s781_s24  ;;  %s337_s27 = sshll.u32 %s329_s30, 4  ;;  %s338_s27 = int_to_ptr.vmem [resolvable:$true] %s337_s27 }
  0x1f   : > { %s335_s18 = sshll.u32 %s334_s29, 4  ;;  %p1175_p2 = pnand %p815_p5, %p70_p7  ;;  %s336_s18 = int_to_ptr.hbm [resolvable:$true] %s335_s18 }
  0x20   : > { %s326_s15 = scalar_lea.sflag [#allocation4], %s325_s22  ;;  %s930_s3 = sshra.s32 %s336_s18, 4  ;;  %s931_s3 = int_to_ptr.hbm [resolvable:$true] %s930_s3 }
  0x21   : > { %s932_s7 = scalar_lea.hbm %s931_s3, 16  ;;  %p934_p10 = pneg %p1175_p2 }
  0x22   : > { %p933_p9 = scmp.ne.s32.totalorder %s931_s3, %s932_s7  ;;  %s937_s25 = scalar_lea.hbm %s1284_s1, 32 }
  0x23   : > { %p938_p0 = scmp.lt.s32.totalorder %s931_s3, %s1284_s1  ;;  %p939_p5 = scmp.lt.s32.totalorder %s937_s25, %s932_s7 }
  0x24   : > { %p935_p12 = pnand %p934_p10, %p933_p9 }
  0x25   : > { %p940_p7 = por %p939_p5, %p938_p0 }
  0x26   : > { %p936_p13 = pneg %p935_p12 }
  0x28   : > { %p941_p11 = pnand %p940_p7, %p936_p13 }
  0x2a   : > { %944 = shalt.err (!%p941_p11)
}
  0x2b   : > { %s1304_s22 = smov 8   ;;  %s1305_s30 = smov 128  }
  0x2c   : > { %808 = dma.hbm_to_vmem [thread:$0]  (!%p1175_p2), %s336_s18, 256, %s338_s27, %s326_s15, %s1305_s30, %s1305_s30, %s1304_s22  }
  0x2d   : > { %358 = sbr.rel (%p1133_p8) target bundleno = 640 (0x280), region = 56  ;;  %s1195_s24 = sand.u32 (!%p1133_p8), 1, %s1022_s12  }
  0x2e   : > { %s766_s3 = sshll.u32 (!%p1133_p8), %s1195_s24, 4  ;;  %s361_s7 = scalar_lea.sflag (!%p1133_p8), [#allocation4], %s1195_s24 }
  0x2f   : > { %s1199_s23 = scalar_lea.vmem (!%p1133_p8), [#allocation3], %s766_s3 }
  0x32   : > { %1005 = dma.done.wait (%p1120_p4), %s361_s7, 256  }
  0x33   : > { %1007 = vsyncadd (%p1120_p4), %s361_s7, 4294967040 }
  0x34   : > { %1009 = dma.done.wait (%p75_p1), [#allocation7], 1024  }
  0x35   : > { %1011 = vsyncadd (%p75_p1), [#allocation7], 4294966272  ;;  %s1210_s21 = sshll.u32 %s1111_s6, 1  ;;  %v442_v1 = vld [vmem:[#allocation6 + $0x18] sm:$0xff]  ;;  %v441_v2 = vld [vmem:[#allocation6 + $0x10] sm:$0xff]  ;;  %vm447_vm0 = vcmask 261120  }
  0x36   : > { %p421_p8 = scmp.lt.s32.totalorder %s1210_s21, 3  ;;  %466 = vmatpush.msra.mxu0 %v442_v1  ;;  %782 = vmatpush.msra.mxu2 %v442_v1  ;;  %v440_v3 = vld [vmem:[#allocation6 + $0x8] sm:$0xff]  ;;  %v439_v4 = vld [vmem:[#allocation6] sm:$0xff]  ;;  %v858_v7 = vld [vmem:[%s1287_s4] ss:$0 sm:$0xff]  ;;  %vm503_vm1 = vcmask 7168  }
  0x37   : > { %v859_v10 = vld [vmem:[%s1288_s5] ss:$0 sm:$0xff]  ;;  %v1036_v40 = vmov 0   ;;  %vm602_vm10 = vcmask 1041409   ;;  %s769_s7 = sshll.u32 %s1195_s24, 1  ;;  %s629_s26 = scalar_lea.sflag [#allocation5], %s1195_s24 }
  0x38   : > { %s1214_s27 = scalar_select %p421_p8, %s1210_s21, 3  ;;  %467 = vmatpush.msra.mxu0 %v441_v2  ;;  %783 = vmatpush.msra.mxu2 %v441_v2  ;;  %v860_v19 = vld [vmem:[#allocation2] ss:$0 sm:$0xff] }
  0x39   : > { %856 = vset.pattern.permute.xlu1 %v1036_v40  ;;  %857 = vset.pattern.permute.xlu0 %v1036_v40 }
  0x3a   : > { %s771_s28 = sshll.u32 %s1214_s27, 3  ;;  %468 = vmatpush.msra.mxu0 %v440_v3  ;;  %784 = vmatpush.msra.mxu2 %v440_v3 }
  0x3b   : > { %s424_s15 = scalar_lea.vmem %s1283_s0, %s771_s28  ;;  %s431_s3 = scalar_lea.vmem %s1285_s2, %s771_s28 }
  0x3c   : > { %v433_v5 = vld [vmem:[%s424_s15] sm:$0xff]  ;;  %v434_v6 = vld [vmem:[%s424_s15 + $0x8] sm:$0xff]  ;;  %469 = vmatpush.msra.mxu0 %v439_v4  ;;  %785 = vmatpush.msra.mxu2 %v439_v4  ;;  %s639_s28 = scalar_lea.hbm %s1292_s9, %s1210_s21  ;;  %s419_s15 = scalar_lea.vmem [#allocation9], %s769_s7 }
  0x3d   : > { %774 = vmatmul.msk.f32.vlgmr.msra.gmra.mxu0 %vm447_vm0, %v433_v5  ;;  %775 = vmatmul.msk.f32.vlgmr.msra.gmra.mxu2 %vm447_vm0, %v434_v6  ;;  %v437_v20 = vld [vmem:[%s431_s3] sm:$0xff]  ;;  %v438_v27 = vld [vmem:[%s431_s3 + $0x8] sm:$0xff]  ;;  %s641_s6 = sshll.u32 %s419_s15, 4  ;;  %s643_s25 = sshll.u32 %s639_s28, 4  ;;  %s642_s6 = int_to_ptr.vmem [resolvable:$true] %s641_s6  ;;  %s644_s25 = int_to_ptr.hbm [resolvable:$true] %s643_s25 }
  0x3e   : > { %s974_s29 = sshra.s32 %s644_s25, 4  ;;  %s980_s3 = scalar_lea.hbm %s1292_s9, 4  ;;  %s975_s29 = int_to_ptr.hbm [resolvable:$true] %s974_s29 }
  0x3f   : > { %s976_s22 = scalar_lea.hbm %s975_s29, 2  ;;  %p981_p2 = scmp.lt.s32.totalorder %s975_s29, %s1292_s9 }
  0x40   : > { %p977_p1 = scmp.ne.s32.totalorder %s975_s29, %s976_s22  ;;  %p982_p9 = scmp.lt.s32.totalorder %s980_s3, %s976_s22 }
  0x42   : > { %p978_p4 = pnand %p977_p1, %p1162_p3  ;;  %p983_p10 = por %p982_p9, %p981_p2 }
  0x44   : > { %p979_p11 = pneg %p978_p4 }
  0x46   : > { %p984_p12 = pnand %p983_p10, %p979_p11 }
  0xba   : > { %v471_v8 = vpop.f32.mrf.mxu0 }
  0xbb   : > { %v472_v9 = vadd.f32 %v858_v7, %v471_v8 }
  0xbd   : > { %v477_v11 = vmax.f32 %v472_v9, 0.0 }
  0xbf   : > { %v488_v12 = vmul.f32 %v859_v10, %v477_v11 }
  0xc0   : > { %v474_v13 = vpop.f32.mrf.mxu2 }
  0xc1   : > { %v475_v14 = vadd.f32 %v858_v7, %v474_v13  ;;  %v490_v15 = vsel %vm447_vm0, %v488_v12, 0.0 }
  0xc2   : > { %491 = vadd.xlane.f32.xlu0 %v490_v15 }
  0xc3   : > { %v478_v16 = vmax.f32 %v475_v14, 0.0 }
  0xc5   : > { %v489_v17 = vmul.f32 %v859_v10, %v478_v16 }
  0xc7   : > { %v493_v18 = vsel %vm447_vm0, %v489_v17, 0.0 }
  0xca   : > { %494 = vadd.xlane.f32.xlu0 %v493_v18 }
 0x135   : > { %v492_v21 = vpop.xlane.xlu0 %491 }
 0x136   : > { %v499_v22 = vadd.f32 %v860_v19, %v492_v21  ;;  %v599_v21 = vld [vmem:[#allocation8 + $0x18] sm:$0xff] }
 0x137   : > { %618 = vmatpush.msra.mxu1 %v599_v21 }
 0x138   : > { %v501_v23 = vadd.f32 %v499_v22, %v437_v20  ;;  %v598_v22 = vld [vmem:[#allocation8 + $0x10] sm:$0xff] }
 0x139   : > { %619 = vmatpush.msra.mxu1 %v598_v22 }
 0x13a   : > { %v504_v24 = vsel %vm503_vm1, %v501_v23, -inf }
 0x13b   : > { %v505_v25 = vrot.slane %v504_v24, 4 }
 0x13d   : > { %v506_v26 = vmax.f32 %v504_v24, %v505_v25  ;;  %v495_v28 = vpop.xlane.xlu0 %494  ;;  %v596_v24 = vld [vmem:[#allocation8] sm:$0xff] }
 0x13e   : > { %v500_v29 = vadd.f32 %v860_v19, %v495_v28  ;;  %v435_v25 = vld [vmem:[%s1199_s23] sm:$0xff] }
 0x13f   : > { %v507_v30 = vrot.slane %v506_v26, 2 }
 0x140   : > { %v502_v31 = vadd.f32 %v500_v29, %v438_v27 }
 0x141   : > { %v508_v32 = vmax.f32 %v506_v26, %v507_v30 }
 0x142   : > { %v511_v33 = vsel %vm503_vm1, %v502_v31, -inf }
 0x143   : > { %v509_v34 = vrot.slane %v508_v32, 1  ;;  %v512_v35 = vrot.slane %v511_v33, 4 }
 0x145   : > { %v510_v36 = vmax.f32 %v508_v32, %v509_v34  ;;  %v513_v37 = vmax.f32 %v511_v33, %v512_v35 }
 0x147   : > { %v518_v38 = vsub.f32 %v501_v23, %v510_v36  ;;  %v514_v39 = vrot.slane %v513_v37, 2  ;;  %v597_v23 = vld [vmem:[#allocation8 + $0x8] sm:$0xff] }
 0x148   : > { %620 = vmatpush.msra.mxu1 %v597_v23 }
 0x149   : > { %v520_v41 = vmul.f32 1.442695, %v518_v38  ;;  %v515_v42 = vmax.f32 %v513_v37, %v514_v39 }
 0x14a   : > { %621 = vmatpush.msra.mxu1 %v596_v24 }
 0x14b   : > { %862 = vpow2.f32 %v520_v41  ;;  %v516_v43 = vrot.slane %v515_v42, 1 }
 0x14d   : > { %v517_v44 = vmax.f32 %v515_v42, %v516_v43 }
 0x14f   : > { %v519_v45 = vsub.f32 %v502_v31, %v517_v44  ;;  %v436_v31 = vld [vmem:[%s1199_s23 + $0x8] sm:$0xff] }
 0x151   : > { %v863_v46 = vpop.eup %862  ;;  %v522_v47 = vmul.f32 1.442695, %v519_v45 }
 0x152   : > { %v524_v48 = vsel %vm503_vm1, %v863_v46, 0.0 }
 0x153   : > { %v525_v49 = vrot.slane %v524_v48, 4  ;;  %864 = vpow2.f32 %v522_v47 }
 0x155   : > { %v526_v50 = vadd.f32 %v525_v49, %v524_v48 }
 0x157   : > { %v527_v51 = vrot.slane %v526_v50, 2 }
 0x159   : > { %v865_v52 = vpop.eup %864  ;;  %v528_v53 = vadd.f32 %v527_v51, %v526_v50 }
 0x15a   : > { %v531_v54 = vsel %vm503_vm1, %v865_v52, 0.0 }
 0x15b   : > { %v529_v55 = vrot.slane %v528_v53, 1  ;;  %v532_v56 = vrot.slane %v531_v54, 4 }
 0x15d   : > { %v530_v57 = vadd.f32 %v529_v55, %v528_v53  ;;  %v533_v58 = vadd.f32 %v532_v56, %v531_v54 }
 0x15f   : > { %866 = vrcp.f32 %v530_v57  ;;  %v534_v59 = vrot.slane %v533_v58, 2  ;;  %v549_v2 = vand.u32 2147483648, %v530_v57  ;;  %v547_v4 = vand.u32 2147483647, %v530_v57 }
 0x160   : > { %vm543_vm3 = vweird.f32 %v530_v57 }
 0x161   : > { %v535_v60 = vadd.f32 %v534_v59, %v533_v58  ;;  %v550_v7 = vor.u32 1.1754944e-38, %v549_v2  ;;  %vm548_vm5 = vcmp.eq.f32.partialorder %v547_v4, 8.507059e+37 }
 0x163   : > { %v536_v61 = vrot.slane %v535_v60, 1 }
 0x165   : > { %v867_v62 = vpop.eup %866  ;;  %v537_v63 = vadd.f32 %v536_v61, %v535_v60 }
 0x166   : > { %v539_v0 = vmul.f32 %v867_v62, %v530_v57  ;;  %vm544_vm2 = vweird.f32 %v867_v62 }
 0x167   : > { %868 = vrcp.f32 %v537_v63  ;;  %vm545_vm4 = vmor %vm543_vm3, %vm544_vm2  ;;  %v564_v13 = vand.u32 2147483648, %v537_v63  ;;  %v562_v15 = vand.u32 2147483647, %v537_v63  ;;  %vm558_vm7 = vweird.f32 %v537_v63 }
 0x168   : > { %v540_v1 = vsub.f32 1.0, %v539_v0 }
 0x169   : > { %v565_v17 = vor.u32 1.1754944e-38, %v564_v13  ;;  %vm563_vm9 = vcmp.eq.f32.partialorder %v562_v15, 8.507059e+37 }
 0x16a   : > { %v541_v3 = vmul.f32 %v867_v62, %v540_v1 }
 0x16c   : > { %v542_v5 = vadd.f32 %v867_v62, %v541_v3 }
 0x16d   : > { %v869_v6 = vpop.eup %868 }
 0x16e   : > { %v546_v8 = vsel %vm545_vm4, %v867_v62, %v542_v5  ;;  %v554_v9 = vmul.f32 %v869_v6, %v537_v63  ;;  %vm559_vm6 = vweird.f32 %v869_v6 }
 0x16f   : > { %v551_v10 = vsel %vm548_vm5, %v550_v7, %v546_v8  ;;  %vm560_vm8 = vmor %vm558_vm7, %vm559_vm6 }
 0x170   : > { %v568_v11 = vmul.f32 %v863_v46, %v551_v10  ;;  %v555_v12 = vsub.f32 1.0, %v554_v9  ;;  %v861_v46 = vld [vmem:[%s1291_s8] ss:$0 sm:$0xff] }
 0x172   : > { %572 = vperm.xlu1 %856, %v568_v11   ;;  %v556_v14 = vmul.f32 %v869_v6, %v555_v12 }
 0x174   : > { %v557_v16 = vadd.f32 %v869_v6, %v556_v14 }
 0x176   : > { %v561_v18 = vsel %vm560_vm8, %v869_v6, %v557_v16 }
 0x177   : > { %v566_v19 = vsel %vm563_vm9, %v565_v17, %v561_v18 }
 0x178   : > { %v569_v20 = vmul.f32 %v865_v52, %v566_v19 }
 0x17a   : > { %577 = vperm.xlu1 %856, %v569_v20  }
 0x1e4   : > { %v573_v26 = vpop.permute.xlu1 %572 }
 0x1e5   : > { %v580_v27 = vmul.f32 %v573_v26, %v435_v25 }
 0x1e7   : > { %v582_v28 = vsel %vm447_vm0, %v580_v27, 0.0 }
 0x1e8   : > { %v583_v29 = vrot.slane %v582_v28, 4 }
 0x1ea   : > { %v584_v30 = vadd.f32 %v583_v29, %v582_v28 }
 0x1ec   : > { %v578_v32 = vpop.permute.xlu1 %577  ;;  %v585_v34 = vrot.slane %v584_v30, 2 }
 0x1ed   : > { %v581_v33 = vmul.f32 %v578_v32, %v436_v31 }
 0x1ee   : > { %v586_v37 = vadd.f32 %v585_v34, %v584_v30 }
 0x1ef   : > { %v589_v35 = vsel %vm447_vm0, %v581_v33, 0.0 }
 0x1f0   : > { %v590_v36 = vrot.slane %v589_v35, 4  ;;  %v587_v40 = vrot.slane %v586_v37, 1 }
 0x1f2   : > { %v591_v38 = vadd.f32 %v590_v36, %v589_v35  ;;  %v588_v43 = vadd.f32 %v587_v40, %v586_v37 }
 0x1f4   : > { %v592_v39 = vrot.slane %v591_v38, 2 }
 0x1f6   : > { %v593_v41 = vadd.f32 %v592_v39, %v591_v38 }
 0x1f8   : > { %v594_v42 = vrot.slane %v593_v41, 1 }
 0x1fa   : > { %v595_v44 = vadd.f32 %v594_v42, %v593_v41 }
 0x1fc   : > { %v603_v45 = vsel %vm602_vm10, %v595_v44, %v588_v43 }
 0x1fd   : > { %776 = vmatmul.msk.f32.vlgmr.msra.gmra.mxu1 %vm447_vm0, %v603_v45 }
 0x27a   : > { %v623_v47 = vpop.f32.mrf.mxu1 }
 0x27b   : > { %v626_v48 = vadd.f32 %v861_v46, %v623_v47 }
 0x27d   : > { %627 = vst [vmem:[%s419_s15] sm:$0x3] %v626_v48 }
 0x27e   : > { %987 = shalt.err (!%p984_p12)
}
 0x27f   : > { %796 = dma.vmem_to_hbm [thread:$0]  (%p1162_p3), %s642_s6, 32, %s644_s25, %s629_s26  }
 0x280 PF: > { %s655_s24 = sand.u32 1, %s1018_s11   ;;  %p1306_p13 = scmp.ge.s32.totalorder %s1030_s14, 2 }
 0x281   : > { %s656_s27 = scalar_lea.sflag [#allocation5], %s655_s24 }
 0x282   : > { %p810_p0 = pnand %p1306_p13, %p1125_p6 }
 0x284   : > { %p811_p5 = pneg %p810_p0 }
 0x286   : > { %1013 = dma.done.wait (%p811_p5), %s656_s27, 32  }
 0x287   : > { %1015 = vsyncadd (%p811_p5), %s656_s27, 4294967264  ;;  %p25_p7 = scmp.ge.s32.totalorder %s1152_s10, 4   ;;  %s1307_s11 = smov %s1022_s12 }
 0x288   : > { %s1308_s12 = smov %s1026_s13  ;;  %s1309_s13 = smov %s1168_s20 }
 0x289   : > { %s1310_s14 = smov %s1152_s10  ;;  %27 = sbr.rel (!%p25_p7) target bundleno = 9 (0x9), region = 115 }
 0x28e   :  { %662 = vsyncpa [#allocation4], 1 }
 0x28f   :  { %664 = vsyncpa [#allocation4 + $0x1], 1 }
 0x290   :  { %665 = vsyncpa [#allocation7], 1 }
 0x291   :  { %666 = vsyncpa [#allocation5], 1 }
 0x292   :  { %668 = vsyncpa [#allocation5 + $0x1], 1 }

</bundles_post_ra>
